<compile_context>
chip_gen: v5e
topology: v5e:2x2
jax: 0.10.0
libtpu: 0.0.40
codegen_flags: <defaults>
</compile_context>

<pallas_src>
import jax
import jax.numpy as jnp
from jax.experimental import pallas as pl
from jax.experimental.pallas import tpu as pltpu


_MAX_INFLIGHT_DMAS = 4          # descriptors kept in flight at once
_MIN_BYTES_PER_CHUNK = 1 << 20  # below ~1 MiB a single DMA is already optimal


def _make_hbm_copy_kernel(chunks):
    """Build a kernel that copies `chunks` (static (start, rows) pairs along
    the leading axis) directly HBM->HBM with overlapped async DMAs."""

    def kernel(x_hbm, o_hbm, sems):
        copies = []
        for idx, (start, rows) in enumerate(chunks):
            cp = pltpu.make_async_copy(
                x_hbm.at[pl.ds(start, rows)],
                o_hbm.at[pl.ds(start, rows)],
                sems.at[idx],
            )
            cp.start()
            copies.append(cp)
        for cp in copies:
            cp.wait()

    return kernel


def _pallas_identity_copy(x: jax.Array) -> jax.Array:
    """Materialize a copy of x via chunked HBM->HBM DMA (no VMEM round trip,
    no padding, works for any shape/dtype)."""
    squeeze_back = False
    if x.ndim == 0:
        x = x.reshape(1)
        squeeze_back = True

    itemsize = jnp.dtype(x.dtype).itemsize
    nbytes = x.size * itemsize
    lead = x.shape[0]

    # Static chunking along the (contiguous) leading axis.
    num_chunks = int(max(1, min(_MAX_INFLIGHT_DMAS, lead,
                                nbytes // _MIN_BYTES_PER_CHUNK)))
    chunk_rows = -(-lead // num_chunks)  # ceil div
    chunks = []
    start = 0
    while start < lead:
        rows = min(chunk_rows, lead - start)
        chunks.append((start, rows))
        start += rows

    y = pl.pallas_call(
        _make_hbm_copy_kernel(chunks),
        out_shape=jax.ShapeDtypeStruct(x.shape, x.dtype),
        in_specs=[pl.BlockSpec(memory_space=pl.ANY)],
        out_specs=pl.BlockSpec(memory_space=pl.ANY),
        scratch_shapes=[pltpu.SemaphoreType.DMA((len(chunks),))],
        cost_estimate=pl.CostEstimate(
            flops=0, transcendentals=0, bytes_accessed=2 * nbytes),
    )(x)

    if squeeze_back:
        y = y.reshape(())
    return y


def base_module_forward(x: jax.Array, *, is_no_grad: bool = False,
                        use_pallas: bool = False) -> jax.Array:
    """Pallas equivalent of BaseModule.forward (identity).

    Default path is the true optimum for an identity module: `return x`
    (zero HBM traffic).  Set use_pallas=True to force a materialized copy
    via the chunked HBM->HBM DMA kernel (e.g. to mimic torch semantics of
    is_debug's output.clone()).
    """
    if use_pallas:
        out = _pallas_identity_copy(x)
    else:
        out = x
    if is_no_grad:
        out = jax.lax.stop_gradient(out)
    return out


if __name__ == "__main__":
    key = jax.random.PRNGKey(0)

    # 1) Small NCHW example; exercise the DMA copy kernel (single chunk).
    x = jax.random.normal(key, (2, 4, 16, 16), dtype=jnp.float32)
    y = base_module_forward(x, is_no_grad=False, use_pallas=True)
    jax.block_until_ready(y)
    assert y.shape == x.shape and y.dtype == x.dtype
    assert bool(jnp.all(y == x))

    # 2) Non-128-aligned + sub-32-bit dtype: no padding needed on the DMA path.
    x2 = jax.random.normal(jax.random.PRNGKey(1), (3, 5, 7), dtype=jnp.bfloat16)
    y2 = base_module_forward(x2, is_no_grad=True, use_pallas=True)
    jax.block_until_ready(y2)
    assert y2.shape == x2.shape and y2.dtype == x2.dtype
    assert bool(jnp.all(y2 == x2))

    # 3) Slightly larger input (4 MiB) so multiple DMA chunks are in flight.
    x3 = jax.random.normal(jax.random.PRNGKey(2), (8, 256, 512),
                           dtype=jnp.float32)
    y3 = base_module_forward(x3, use_pallas=True)
    jax.block_until_ready(y3)
    assert y3.shape == x3.shape and y3.dtype == x3.dtype
    assert bool(jnp.all(y3 == x3))

    # 4) Default (optimal) zero-copy identity path.
    y4 = base_module_forward(x)
    jax.block_until_ready(y4)
    assert bool(jnp.all(y4 == x))

    print("KERNEL_OK")
</pallas_src>

<mosaic_0001>
module attributes {stable_mosaic.version = 11 : i64} {
  func.func @kernel(%arg0: memref<2x4x16x16xf32, #tpu.memory_space<any>>, %arg1: memref<2x4x16x16xf32, #tpu.memory_space<any>>, %arg2: memref<1x!tpu.dma_semaphore, #tpu.memory_space<semaphore_mem>>) attributes {dimension_semantics = [], scalar_prefetch = 0 : i64, scratch_operands = 1 : i64, tpu.core_type = #tpu.core_type<tc>} {
    %c0_i32 = arith.constant 0 : i32
    %c0_i32_0 = arith.constant 0 : i32
    %c0_i32_1 = arith.constant 0 : i32
    %c0_i32_2 = arith.constant 0 : i32
    %c0_i32_3 = arith.constant 0 : i32
    %0 = tpu.memref_slice %arg0[%c0_i32_0, %c0_i32_1, %c0_i32_2, %c0_i32_3] : memref<2x4x16x16xf32, #tpu.memory_space<any>> -> memref<2x4x16x16xf32, #tpu.memory_space<any>>
    %c0_i32_4 = arith.constant 0 : i32
    %c0_i32_5 = arith.constant 0 : i32
    %c0_i32_6 = arith.constant 0 : i32
    %c0_i32_7 = arith.constant 0 : i32
    %1 = tpu.memref_slice %arg1[%c0_i32_4, %c0_i32_5, %c0_i32_6, %c0_i32_7] : memref<2x4x16x16xf32, #tpu.memory_space<any>> -> memref<2x4x16x16xf32, #tpu.memory_space<any>>
    %2 = tpu.memref_slice %arg2[%c0_i32] : memref<1x!tpu.dma_semaphore, #tpu.memory_space<semaphore_mem>> -> memref<1x!tpu.dma_semaphore, #tpu.memory_space<semaphore_mem>>
    %3 = tpu.memref_squeeze %2 : memref<1x!tpu.dma_semaphore, #tpu.memory_space<semaphore_mem>> -> memref<!tpu.dma_semaphore, #tpu.memory_space<semaphore_mem>>
    tpu.enqueue_dma source(%0 : memref<2x4x16x16xf32, #tpu.memory_space<any>>) target(%1 : memref<2x4x16x16xf32, #tpu.memory_space<any>>) target_semaphore(%3 : memref<!tpu.dma_semaphore, #tpu.memory_space<semaphore_mem>>)
    %c0_i32_8 = arith.constant 0 : i32
    %c0_i32_9 = arith.constant 0 : i32
    %c0_i32_10 = arith.constant 0 : i32
    %c0_i32_11 = arith.constant 0 : i32
    %c0_i32_12 = arith.constant 0 : i32
    %4 = tpu.memref_slice %arg0[%c0_i32_9, %c0_i32_10, %c0_i32_11, %c0_i32_12] : memref<2x4x16x16xf32, #tpu.memory_space<any>> -> memref<2x4x16x16xf32, #tpu.memory_space<any>>
    %c0_i32_13 = arith.constant 0 : i32
    %c0_i32_14 = arith.constant 0 : i32
    %c0_i32_15 = arith.constant 0 : i32
    %c0_i32_16 = arith.constant 0 : i32
    %5 = tpu.memref_slice %arg1[%c0_i32_13, %c0_i32_14, %c0_i32_15, %c0_i32_16] : memref<2x4x16x16xf32, #tpu.memory_space<any>> -> memref<2x4x16x16xf32, #tpu.memory_space<any>>
    %6 = tpu.memref_slice %arg2[%c0_i32_8] : memref<1x!tpu.dma_semaphore, #tpu.memory_space<semaphore_mem>> -> memref<1x!tpu.dma_semaphore, #tpu.memory_space<semaphore_mem>>
    %7 = tpu.memref_squeeze %6 : memref<1x!tpu.dma_semaphore, #tpu.memory_space<semaphore_mem>> -> memref<!tpu.dma_semaphore, #tpu.memory_space<semaphore_mem>>
    tpu.wait_dma2 semaphore(%7 : memref<!tpu.dma_semaphore, #tpu.memory_space<semaphore_mem>>) src(%4 : memref<2x4x16x16xf32, #tpu.memory_space<any>>) dst(%5 : memref<2x4x16x16xf32, #tpu.memory_space<any>>)
    return
  }
}

</mosaic_0001>

<bundles_post_ra>
// kernel: tpu_custom_call.1
= control target key start
LH: loop header
LB: loop body
LE: loop exit
PB: predicated region body
PF: predicated region fallthrough
CT: control target
= control target key end

     0   :  { %s34_s12 = smov [#allocation2]   ;;  %s35_s13 = smov [#allocation3]   ;;  %s53_s0 = inlined_call_operand.hbm [shape: f32[2,4,16,16], index: 0, kind: input, shape index: {}]   ;;  %s54_s1 = inlined_call_operand.hbm [shape: f32[2,4,16,16], index: 1, kind: output, shape index: {}]  }
   0x1   :  { %s10_s8 = sshll.u32 %s53_s0, 4  ;;  %s12_s11 = sshll.u32 %s54_s1, 4  ;;  %s11_s8 = int_to_ptr.hbm [resolvable:$true] %s10_s8  ;;  %s13_s11 = int_to_ptr.hbm [resolvable:$true] %s12_s11 }
   0x2   :  { %s36_s14 = smov 0  }
   0x3   :  { %16 = dma.general %s11_s8, 2048, %s13_s11, %s34_s12, %s35_s13, [#allocation4], %s36_s14, 0  }
   0x4   :  { %32 = dma.done.wait [#allocation2], 2048 }
   0x5   :  { %33 = vsyncadd [#allocation2], 4294965248 }
   0x6   :  { %22 = vsyncmov [#allocation2] }
   0x9   :  { %s23_s15 = vpop.sfrf %22 }
   0xa   :  { %p28_p0 = scmp.ne.s32.totalorder %s23_s15, 0 }
   0xc   :  { %27 = shalt.err (%p28_p0)  }

</bundles_post_ra>
